<compile_context>
chip_gen: v7x
topology: tpu7x:2x2x1
jax: 0.10.0
libtpu: 0.0.40
codegen_flags: <defaults>
</compile_context>

<pallas_src>
import jax
import jax.numpy as jnp
from jax.experimental import pallas as pl
from jax.experimental.pallas import tpu as pltpu


def _round_up(v, m):
    return ((v + m - 1) // m) * m


def _vmem_capacity_bytes():
    # Generation-aware physical VMEM (128 MiB on v5e/v6e, 64 MiB per TC on v7x).
    try:
        return int(pltpu.get_tpu_info().vmem_capacity_bytes)
    except Exception:
        return 64 * 1024 * 1024  # conservative fallback (v7x per-TC VMEM)


def _footprint_bytes(tile_b, tile_n, D, w_itemsize, dist_itemsize):
    # Double-buffered pipeline tiles + persistent scratch.
    dbuf = 2 * (tile_b * D * 4                 # x (f32)
                + D * tile_n * w_itemsize      # w
                + tile_n * 4                   # w_sq
                + tile_b * tile_n * dist_itemsize   # dist
                + tile_b * 128 * 4)            # idx slab
    scratch = tile_b * 4 * 3                   # minv, mini, xsq
    return dbuf + scratch


def _choose_tiles(B, D, N, tile_b, tile_n, w_itemsize, dist_itemsize, budget):
    tile_n = min(tile_n, _round_up(N, 128))
    tile_b = min(tile_b, _round_up(B, 8))
    # Guarantee >= 2 batch tiles when B allows it: the batch axis is the only
    # megacore-shardable ("parallel") axis, so a single batch tile would idle
    # one TensorCore on v7x.
    if B > 8:
        tile_b = min(tile_b, _round_up(pl.cdiv(B, 2), 8))
    # Refit tiles to the needed tile count to keep padding waste low.
    tile_b = _round_up(pl.cdiv(B, pl.cdiv(B, tile_b)), 8)
    tile_n = _round_up(pl.cdiv(N, pl.cdiv(N, tile_n)), 128)
    # Shrink until the double-buffered footprint fits the VMEM budget.
    while _footprint_bytes(tile_b, tile_n, D, w_itemsize, dist_itemsize) > budget \
            and tile_n > 128:
        tile_n = max(128, _round_up(tile_n // 2, 128))
    while _footprint_bytes(tile_b, tile_n, D, w_itemsize, dist_itemsize) > budget \
            and tile_b > 8:
        tile_b = max(8, _round_up(tile_b // 2, 8))
    return tile_b, tile_n


def _sofm1d_kernel(x_ref, w_ref, wsq_ref, dist_ref, idx_ref,
                   minv_ref, mini_ref, xsq_ref):
    n = pl.program_id(1)

    @pl.when(n == 0)
    def _init():
        # ||x||^2 hoisted: computed once per batch tile, reused across all
        # neuron tiles (the x block is identical for every n).
        x0 = x_ref[...]
        xsq_ref[...] = jnp.sum(x0 * x0, axis=1, keepdims=True)
        minv_ref[...] = jnp.full(minv_ref.shape, jnp.inf, minv_ref.dtype)
        mini_ref[...] = jnp.zeros(mini_ref.shape, mini_ref.dtype)

    x = x_ref[...]                                   # (tile_b, D) f32
    w = w_ref[...]                                   # (D, tile_n), pre-scaled by -2

    # ||w_j - x_b||^2 = ||x_b||^2 + (-2 x_b . w_j) + ||w_j||^2.
    # Cross term (with the -2 folded into w) on the MXU; norms precomputed.
    xw = jnp.dot(x.astype(w.dtype), w, preferred_element_type=jnp.float32)
    dist = xsq_ref[...] + xw + wsq_ref[...]          # (tile_b, tile_n) f32
    dist = jnp.maximum(dist, 0.0)                    # guard against cancellation
    dist_ref[...] = dist.astype(dist_ref.dtype)

    # Local argmin within this neuron tile (first index on ties, like torch).
    local_min = jnp.min(dist, axis=1, keepdims=True)                  # (tile_b,1)
    col = jax.lax.broadcasted_iota(jnp.int32, dist.shape, 1) + n * dist.shape[1]
    sentinel = jnp.iinfo(jnp.int32).max
    local_idx = jnp.min(jnp.where(dist == local_min, col, sentinel),
                        axis=1, keepdims=True)                        # (tile_b,1)

    # Carry running (min, argmin) across neuron tiles; strict '<' keeps the
    # earlier tile's index on exact ties (torch.argmin semantics).
    better = local_min < minv_ref[...]
    minv_ref[...] = jnp.where(better, local_min, minv_ref[...])
    mini_ref[...] = jnp.where(better, local_idx, mini_ref[...])

    @pl.when(n == pl.num_programs(1) - 1)
    def _finalize():
        idx_ref[...] = jnp.broadcast_to(mini_ref[...], idx_ref.shape)

    # TODO(synk): the reference forward's `deltas.append()` / lr weight-update
    # path is unfinished in the source module, so no weight update is emitted.


def sofm1d_forward(x, w, *, tile_b=256, tile_n=512,
                   matmul_dtype=jnp.bfloat16, dist_dtype=jnp.float32):
    """SOFM1D forward.

    x: (B, input_size) f32, w: (input_size, output_size) f32.
    Returns (distances (B, output_size) dist_dtype, bmu_index (B,) int32).

    matmul_dtype=bfloat16 (default) halves the dominant HBM read (w is
    re-streamed once per batch tile) and gets native MXU rate on v5e/v6e/v7x;
    distances lose ~3 digits and near-tie argmins may flip.  Pass
    matmul_dtype=float32 for exact-precision distances.
    dist_dtype=bfloat16 additionally halves the dist writeback stream.
    """
    x = jnp.asarray(x, jnp.float32)
    w = jnp.asarray(w, jnp.float32)
    B, D = x.shape
    Dw, N = w.shape
    assert D == Dw, (D, Dw)

    w_itemsize = jnp.dtype(matmul_dtype).itemsize
    dist_itemsize = jnp.dtype(dist_dtype).itemsize

    vmem_cap = _vmem_capacity_bytes()
    budget = int(0.7 * vmem_cap)      # headroom for compiler-internal scratch

    tile_b, tile_n = _choose_tiles(B, D, N, tile_b, tile_n,
                                   w_itemsize, dist_itemsize, budget)
    b_pad = _round_up(B, tile_b)
    n_pad = _round_up(N, tile_n)

    vmem_est = _footprint_bytes(tile_b, tile_n, D, w_itemsize, dist_itemsize)
    if vmem_est > budget:
        raise ValueError(
            f"estimated VMEM footprint {vmem_est / 2**20:.1f} MiB exceeds "
            f"budget {budget / 2**20:.1f} MiB even at minimum tiles; "
            "input_size too large for this kernel's tiling")
    # Explicit scoped-VMEM limit: the defaults (16 MiB v5e / 32 MiB v6e,v7x)
    # can be below our footprint; never exceed ~90% of physical capacity.
    vmem_limit = int(min(0.9 * vmem_cap, max(vmem_est + (8 << 20), 32 << 20)))

    # Hoisted once: per-neuron squared norms (f32, from the unscaled w).
    # Padded neuron columns get +inf so they can never win the argmin.
    w_sq = jnp.sum(w * w, axis=0, keepdims=True)                      # (1, N)
    w_sq = jnp.pad(w_sq, ((0, 0), (0, n_pad - N)), constant_values=jnp.inf)
    # Fold the -2 of the cross term into w (power of two -> bit-exact).
    w_p = jnp.pad(-2.0 * w, ((0, 0), (0, n_pad - N))).astype(matmul_dtype)
    x_p = jnp.pad(x, ((0, b_pad - B), (0, 0)))

    grid = (b_pad // tile_b, n_pad // tile_n)
    num_b_tiles = grid[0]

    cost = pl.CostEstimate(
        flops=2 * b_pad * D * n_pad,
        transcendentals=0,
        bytes_accessed=(x_p.size * 4
                        + num_b_tiles * (w_p.size * w_itemsize + w_sq.size * 4)
                        + b_pad * n_pad * dist_itemsize
                        + b_pad * 128 * 4),
    )

    dist_p, idx_p = pl.pallas_call(
        _sofm1d_kernel,
        out_shape=(
            jax.ShapeDtypeStruct((b_pad, n_pad), dist_dtype),
            jax.ShapeDtypeStruct((b_pad, 128), jnp.int32),
        ),
        grid_spec=pltpu.PrefetchScalarGridSpec(
            num_scalar_prefetch=0,
            grid=grid,
            in_specs=[
                pl.BlockSpec((tile_b, D), lambda i, n: (i, 0)),        # x
                # TODO(synk): if a bundle dump shows the w DMA exposed for
                # large D, add pipeline_mode=pl.Buffered(3) here (VMEM allows).
                pl.BlockSpec((D, tile_n), lambda i, n: (0, n)),        # w (* -2)
                pl.BlockSpec((1, tile_n), lambda i, n: (0, n)),        # w_sq
            ],
            out_specs=(
                pl.BlockSpec((tile_b, tile_n), lambda i, n: (i, n)),   # dist
                pl.BlockSpec((tile_b, 128), lambda i, n: (i, 0)),      # idx slab
            ),
            scratch_shapes=[
                pltpu.VMEM((tile_b, 1), jnp.float32),   # running min value
                pltpu.VMEM((tile_b, 1), jnp.int32),     # running argmin
                pltpu.VMEM((tile_b, 1), jnp.float32),   # ||x||^2 (per batch tile)
            ],
        ),
        compiler_params=pltpu.CompilerParams(
            dimension_semantics=("parallel", "arbitrary"),
            vmem_limit_bytes=vmem_limit),
        cost_estimate=cost,
    )(x_p, w_p, w_sq)

    return dist_p[:B, :N], idx_p[:B, 0]


def get_scaled_random_weights(key, shape, lo, hi):
    # Deterministic equivalent of the module's uniform [-1, 1] weight init.
    return jax.random.uniform(key, shape, dtype=jnp.float32, minval=lo, maxval=hi)


if __name__ == "__main__":
    key = jax.random.PRNGKey(0)
    k_w, k_x = jax.random.split(key)

    # Small demo shapes; the explicit (tile_b=8, tile_n=128) run exercises both
    # the batch tiling (B=10 -> two 8-row tiles) and the cross-tile running
    # argmin (N=200 -> two 128-neuron tiles).
    batch, input_size, output_size = 10, 32, 200

    w = get_scaled_random_weights(k_w, (input_size, output_size), -1.0, 1.0)
    x = jax.random.normal(k_x, (batch, input_size), dtype=jnp.float32)

    # Pure-JAX reference (mirrors the PyTorch per-sample loop).
    ref_dist = jnp.sum((w.T[None, :, :] - x[:, None, :]) ** 2, axis=-1)  # (B, N)
    ref_bmu = jnp.argmin(ref_dist, axis=1).astype(jnp.int32)

    # 1) Exact-precision path (f32 matmul, f32 distances): strict check.
    dist, bmu = sofm1d_forward(x, w, tile_b=8, tile_n=128,
                               matmul_dtype=jnp.float32,
                               dist_dtype=jnp.float32)
    jax.block_until_ready((dist, bmu))
    assert dist.shape == (batch, output_size), dist.shape
    assert bmu.shape == (batch,), bmu.shape
    assert jnp.allclose(dist, ref_dist, atol=1e-3, rtol=1e-4), "distance mismatch"
    assert jnp.array_equal(bmu, ref_bmu), "BMU index mismatch"

    # 2) Default fast path (bf16 w stream, bf16 distances): loose check.
    dist_fast, bmu_fast = sofm1d_forward(x, w, dist_dtype=jnp.bfloat16)
    jax.block_until_ready((dist_fast, bmu_fast))
    assert dist_fast.shape == (batch, output_size), dist_fast.shape
    assert dist_fast.dtype == jnp.bfloat16
    assert jnp.allclose(dist_fast.astype(jnp.float32), ref_dist,
                        atol=1.0, rtol=0.05), "bf16 distance drift too large"
    assert jnp.all((bmu_fast >= 0) & (bmu_fast < output_size)), "bf16 BMU out of range"

    print("KERNEL_OK")
</pallas_src>

<mosaic_0001>
module attributes {stable_mosaic.version = 11 : i64} {
  func.func @_sofm1d_kernel(%arg0: i32, %arg1: i32, %arg2: memref<8x32xf32, #tpu.memory_space<vmem>>, %arg3: memref<32x128xf32, #tpu.memory_space<vmem>>, %arg4: memref<1x128xf32, #tpu.memory_space<vmem>>, %arg5: memref<8x128xf32, #tpu.memory_space<vmem>>, %arg6: memref<8x128xi32, #tpu.memory_space<vmem>>, %arg7: memref<8x1xf32, #tpu.memory_space<vmem>>, %arg8: memref<8x1xi32, #tpu.memory_space<vmem>>, %arg9: memref<8x1xf32, #tpu.memory_space<vmem>>) attributes {dimension_semantics = [#tpu.dimension_semantics<parallel>, #tpu.dimension_semantics<arbitrary>], iteration_bounds = array<i64: 2, 2>, scalar_prefetch = 0 : i64, scratch_operands = 3 : i64, tpu.core_type = #tpu.core_type<tc>, window_params = [{transform_indices = @transform_0, window_bounds = array<i64: 8, 32>}, {transform_indices = @transform_1, window_bounds = array<i64: 32, 128>}, {transform_indices = @transform_2, window_bounds = array<i64: 1, 128>}, {transform_indices = @transform_3, window_bounds = array<i64: 8, 128>}, {transform_indices = @transform_4, window_bounds = array<i64: 8, 128>}]} {
    %c0_i32 = arith.constant 0 : i32
    %0 = arith.cmpi eq, %arg1, %c0_i32 : i32
    %1 = arith.extui %0 : i1 to i32
    %c0_i32_0 = arith.constant 0 : i32
    %2 = arith.cmpi ne, %1, %c0_i32_0 : i32
    scf.if %2 {
      %c0_24 = arith.constant 0 : index
      %c0_25 = arith.constant 0 : index
      %38 = vector.load %arg2[%c0_24, %c0_25] : memref<8x32xf32, #tpu.memory_space<vmem>>, vector<8x32xf32>
      %39 = arith.mulf %38, %38 : vector<8x32xf32>
      %cst_26 = arith.constant dense<0.000000e+00> : vector<8xf32>
      %40 = vector.multi_reduction <add>, %39, %cst_26 [1] : vector<8x32xf32> to vector<8xf32>
      %41 = vector.shape_cast %40 : vector<8xf32> to vector<8x1xf32>
      %c0_27 = arith.constant 0 : index
      %c0_28 = arith.constant 0 : index
      %42 = vector.load %arg9[%c0_27, %c0_28] : memref<8x1xf32, #tpu.memory_space<vmem>>, vector<8x1xf32>
      tpu.vector_store %arg9[%c0_27, %c0_28], %41 {strides = array<i32>} : memref<8x1xf32, #tpu.memory_space<vmem>>, vector<8x1xf32>,
      %cst_29 = arith.constant 0x7F800000 : f32
      %43 = vector.broadcast %cst_29 : f32 to vector<8x1xf32>
      %c0_30 = arith.constant 0 : index
      %c0_31 = arith.constant 0 : index
      %44 = vector.load %arg7[%c0_30, %c0_31] : memref<8x1xf32, #tpu.memory_space<vmem>>, vector<8x1xf32>
      tpu.vector_store %arg7[%c0_30, %c0_31], %43 {strides = array<i32>} : memref<8x1xf32, #tpu.memory_space<vmem>>, vector<8x1xf32>,
      %c0_i32_32 = arith.constant 0 : i32
      %45 = vector.broadcast %c0_i32_32 : i32 to vector<8x1xi32>
      %c0_33 = arith.constant 0 : index
      %c0_34 = arith.constant 0 : index
      %46 = vector.load %arg8[%c0_33, %c0_34] : memref<8x1xi32, #tpu.memory_space<vmem>>, vector<8x1xi32>
      tpu.vector_store %arg8[%c0_33, %c0_34], %45 {strides = array<i32>} : memref<8x1xi32, #tpu.memory_space<vmem>>, vector<8x1xi32>,
    } else {
    }
    %c0 = arith.constant 0 : index
    %c0_1 = arith.constant 0 : index
    %3 = vector.load %arg2[%c0, %c0_1] : memref<8x32xf32, #tpu.memory_space<vmem>>, vector<8x32xf32>
    %c0_2 = arith.constant 0 : index
    %c0_3 = arith.constant 0 : index
    %4 = vector.load %arg3[%c0_2, %c0_3] : memref<32x128xf32, #tpu.memory_space<vmem>>, vector<32x128xf32>
    %cst = arith.constant dense<0.000000e+00> : vector<8x128xf32>
    %5 = tpu.matmul %3, %4, %cst {dimension_numbers = #tpu.dot_dimension_numbers<[1], [0], [0], [1], [0, 0, 1, 1], [], []>} : vector<8x32xf32>, vector<32x128xf32>, vector<8x128xf32> -> vector<8x128xf32>
    %c0_4 = arith.constant 0 : index
    %c0_5 = arith.constant 0 : index
    %6 = vector.load %arg9[%c0_4, %c0_5] : memref<8x1xf32, #tpu.memory_space<vmem>>, vector<8x1xf32>
    %7 = vector.broadcast %6 : vector<8x1xf32> to vector<8x128xf32>
    %8 = arith.addf %7, %5 : vector<8x128xf32>
    %c0_6 = arith.constant 0 : index
    %c0_7 = arith.constant 0 : index
    %9 = vector.load %arg4[%c0_6, %c0_7] : memref<1x128xf32, #tpu.memory_space<vmem>>, vector<1x128xf32>
    %10 = vector.broadcast %9 : vector<1x128xf32> to vector<8x128xf32>
    %11 = arith.addf %8, %10 : vector<8x128xf32>
    %cst_8 = arith.constant 0.000000e+00 : f32
    %12 = vector.broadcast %cst_8 : f32 to vector<8x128xf32>
    %13 = arith.maximumf %11, %12 : vector<8x128xf32>
    %c0_9 = arith.constant 0 : index
    %c0_10 = arith.constant 0 : index
    %14 = vector.load %arg5[%c0_9, %c0_10] : memref<8x128xf32, #tpu.memory_space<vmem>>, vector<8x128xf32>
    tpu.vector_store %arg5[%c0_9, %c0_10], %13 {strides = array<i32>} : memref<8x128xf32, #tpu.memory_space<vmem>>, vector<8x128xf32>,
    %cst_11 = arith.constant dense<0x7F800000> : vector<8xf32>
    %15 = vector.multi_reduction <minimumf>, %13, %cst_11 [1] : vector<8x128xf32> to vector<8xf32>
    %16 = vector.shape_cast %15 : vector<8xf32> to vector<8x1xf32>
    %17 = tpu.iota {dimensions = array<i32: 1>} : vector<8x128xi32>
    %c128_i32 = arith.constant 128 : i32
    %18 = arith.muli %arg1, %c128_i32 : i32
    %19 = vector.broadcast %18 : i32 to vector<8x128xi32>
    %20 = arith.addi %17, %19 : vector<8x128xi32>
    %21 = vector.broadcast %16 : vector<8x1xf32> to vector<8x128xf32>
    %22 = arith.cmpf oeq, %13, %21 : vector<8x128xf32>
    %c2147483647_i32 = arith.constant 2147483647 : i32
    %23 = vector.broadcast %c2147483647_i32 : i32 to vector<8x128xi32>
    %24 = arith.select %22, %20, %23 : vector<8x128xi1>, vector<8x128xi32>
    %cst_12 = arith.constant dense<2147483647> : vector<8xi32>
    %25 = vector.multi_reduction <minsi>, %24, %cst_12 [1] : vector<8x128xi32> to vector<8xi32>
    %26 = vector.shape_cast %25 : vector<8xi32> to vector<8x1xi32>
    %c0_13 = arith.constant 0 : index
    %c0_14 = arith.constant 0 : index
    %27 = vector.load %arg7[%c0_13, %c0_14] : memref<8x1xf32, #tpu.memory_space<vmem>>, vector<8x1xf32>
    %28 = arith.cmpf olt, %16, %27 : vector<8x1xf32>
    %c0_15 = arith.constant 0 : index
    %c0_16 = arith.constant 0 : index
    %29 = vector.load %arg7[%c0_15, %c0_16] : memref<8x1xf32, #tpu.memory_space<vmem>>, vector<8x1xf32>
    %30 = arith.select %28, %16, %29 : vector<8x1xi1>, vector<8x1xf32>
    %c0_17 = arith.constant 0 : index
    %c0_18 = arith.constant 0 : index
    %31 = vector.load %arg7[%c0_17, %c0_18] : memref<8x1xf32, #tpu.memory_space<vmem>>, vector<8x1xf32>
    tpu.vector_store %arg7[%c0_17, %c0_18], %30 {strides = array<i32>} : memref<8x1xf32, #tpu.memory_space<vmem>>, vector<8x1xf32>,
    %c0_19 = arith.constant 0 : index
    %c0_20 = arith.constant 0 : index
    %32 = vector.load %arg8[%c0_19, %c0_20] : memref<8x1xi32, #tpu.memory_space<vmem>>, vector<8x1xi32>
    %33 = arith.select %28, %26, %32 : vector<8x1xi1>, vector<8x1xi32>
    %c0_21 = arith.constant 0 : index
    %c0_22 = arith.constant 0 : index
    %34 = vector.load %arg8[%c0_21, %c0_22] : memref<8x1xi32, #tpu.memory_space<vmem>>, vector<8x1xi32>
    tpu.vector_store %arg8[%c0_21, %c0_22], %33 {strides = array<i32>} : memref<8x1xi32, #tpu.memory_space<vmem>>, vector<8x1xi32>,
    %c1_i32 = arith.constant 1 : i32
    %35 = arith.cmpi eq, %arg1, %c1_i32 : i32
    %36 = arith.extui %35 : i1 to i32
    %c0_i32_23 = arith.constant 0 : i32
    %37 = arith.cmpi ne, %36, %c0_i32_23 : i32
    scf.if %37 {
      %c0_24 = arith.constant 0 : index
      %c0_25 = arith.constant 0 : index
      %38 = vector.load %arg8[%c0_24, %c0_25] : memref<8x1xi32, #tpu.memory_space<vmem>>, vector<8x1xi32>
      %39 = vector.shape_cast %38 : vector<8x1xi32> to vector<8x1xi32>
      %40 = vector.broadcast %39 : vector<8x1xi32> to vector<8x128xi32>
      %c0_26 = arith.constant 0 : index
      %c0_27 = arith.constant 0 : index
      %41 = vector.load %arg6[%c0_26, %c0_27] : memref<8x128xi32, #tpu.memory_space<vmem>>, vector<8x128xi32>
      tpu.vector_store %arg6[%c0_26, %c0_27], %40 {strides = array<i32>} : memref<8x128xi32, #tpu.memory_space<vmem>>, vector<8x128xi32>,
    } else {
    }
    return
  }
  func.func @transform_0(%arg0: i32, %arg1: i32) -> (i32, i32) {
    %c0_i32 = arith.constant 0 : i32
    %c0_i32_0 = arith.constant 0 : i32
    return %arg0, %c0_i32 : i32, i32
  }
  func.func @transform_1(%arg0: i32, %arg1: i32) -> (i32, i32) {
    %c0_i32 = arith.constant 0 : i32
    %c0_i32_0 = arith.constant 0 : i32
    return %c0_i32, %arg1 : i32, i32
  }
  func.func @transform_2(%arg0: i32, %arg1: i32) -> (i32, i32) {
    %c0_i32 = arith.constant 0 : i32
    %c0_i32_0 = arith.constant 0 : i32
    return %c0_i32, %arg1 : i32, i32
  }
  func.func @transform_3(%arg0: i32, %arg1: i32) -> (i32, i32) {
    %c0_i32 = arith.constant 0 : i32
    return %arg0, %arg1 : i32, i32
  }
  func.func @transform_4(%arg0: i32, %arg1: i32) -> (i32, i32) {
    %c0_i32 = arith.constant 0 : i32
    %c0_i32_0 = arith.constant 0 : i32
    return %arg0, %c0_i32 : i32, i32
  }
}

</mosaic_0001>

<bundles_post_ra>
// kernel: tpu_custom_call.1
= control target key start
LH: loop header
LB: loop body
LE: loop exit
PB: predicated region body
PF: predicated region fallthrough
CT: control target
= control target key end

     0   :  { %s1528_s0 = inlined_call_operand.hbm [shape: f32[16,32], index: 0, kind: input, shape index: {}]   ;;  %s1529_s1 = inlined_call_operand.hbm [shape: f32[32,256], index: 1, kind: input, shape index: {}]   ;;  %s1530_s2 = inlined_call_operand.vmem [shape: f32[1,256], index: 2, kind: input, shape index: {}]   ;;  %s1531_s3 = inlined_call_operand.hbm [shape: f32[16,256], index: 3, kind: output, shape index: {0}]   ;;  %s1532_s4 = inlined_call_operand.hbm [shape: s32[16,128], index: 4, kind: output, shape index: {1}]  }
   0x1   :  { %1546 = sst [smem:[#allocation27_spill]] %s1528_s0 }
   0x2   :  { %1547 = sst [smem:[#allocation28_spill]] %s1532_s4 }
   0x3   :  { %10 = vsyncpa [#allocation6], 0 }
   0x4   :  { %12 = vsyncpa [#allocation6 + $0x1], 0 }
   0x5   :  { %13 = vsyncpa [#allocation9], 0 }
   0x6   :  { %15 = vsyncpa [#allocation9 + $0x1], 0 }
   0x7   :  { %16 = vsyncpa [#allocation7], 0 }
   0x8   :  { %18 = vsyncpa [#allocation7 + $0x1], 0 }
   0x9   :  { %19 = vsyncpa [#allocation12], 0 }
   0xa   :  { %21 = vsyncpa [#allocation12 + $0x1], 0  ;;  %s1100_s15 = smov 0   ;;  %s1102_s16 = smov 0  }
   0xb   :  { %s1104_s17 = smov 0   ;;  %s1106_s18 = smov 0  }
   0xc   :  { %s1108_s19 = smov 0   ;;  %s1110_s20 = smov 0  }
   0xd   :  { %s1112_s21 = smov 0   ;;  %s1114_s22 = smov 0  }
   0xe   :  { %s1116_s23 = smov 0   ;;  %s1118_s24 = smov 0  }
   0xf   :  { %s1120_s25 = smov 0   ;;  %s1122_s26 = smov 0  }
  0x10   :  { %s1124_s27 = smov 0   ;;  %s1126_s28 = smov 0  }
  0x11 LB: > { %1548 = sst [smem:[#allocation17_spill]] %s1007_s15  ;;  %s1533_s29 = sadd.s32 4294967295, %s1059_s28   ;;  %s1059_s28 = sphi %s1126_s28, %s27_s28   ;;  %s1055_s27 = sphi %s1124_s27, %s1592_s27   ;;  %s1051_s26 = sphi %s1122_s26, %s1591_s26   ;;  %s1047_s25 = sphi %s1120_s25, %s1590_s25   ;;  %s1043_s24 = sphi %s1118_s24, %s1589_s24   ;;  %s1039_s23 = sphi %s1116_s23, %s1600_s23   ;;  %s1035_s22 = sphi %s1114_s22, %s1599_s22   ;;  %s1031_s21 = sphi %s1112_s21, %s1598_s21   ;;  %s1027_s20 = sphi %s1110_s20, %s1597_s20   ;;  %s1023_s19 = sphi %s1108_s19, %s1596_s19   ;;  %s1019_s18 = sphi %s1106_s18, %s1595_s18   ;;  %s1015_s17 = sphi %s1104_s17, %s1586_s17   ;;  %s1011_s16 = sphi %s1102_s16, %s1594_s16   ;;  %s1007_s15 = sphi %s1100_s15, %s1593_s15  }
  0x12   : > { %1549 = sst [smem:[#allocation18_spill]] %s1015_s17  ;;  %s36_s5 = sadd.s32 1, %s1051_s26 }
  0x13   : > { %1550 = sst [smem:[#allocation19_spill]] %s1051_s26  ;;  %s39_s6 = sadd.s32 1, %s1055_s27 }
  0x14   : > { %1551 = sst [smem:[#allocation20_spill]] %s1055_s27  ;;  %p37_p0 = scmp.ge.s32.totalorder %s36_s5, 2 }
  0x15   : > { %s46_s7 = sadd.s32 1, %s1039_s23  ;;  %p53_p1 = scmp.ne.s32.totalorder %s1039_s23, %s1035_s22 }
  0x16   : > { %p54_p2 = scmp.eq.s32.totalorder %s1059_s28, 0  ;;  %s1602_s5 = smov (%p37_p0, %s36_s5), 0 }
  0x17   : > { %1552 = sst [smem:[#allocation21_spill]] %s1602_s5  ;;  %s1604_s6 = smov (!%p37_p0, %s39_s6), %s1055_s27 }
  0x18   : > { %p1186_p3 = por %p54_p2, %p53_p1  ;;  %p59_p4 = scmp.ne.s32.totalorder %s1035_s22, %s1031_s21 }
  0x19   : > { %p41_p5 = scmp.ge.s32.totalorder %s1604_s6, 2  ;;  %p1194_p6 = scmp.eq.s32.totalorder %s1533_s29, 0 }
  0x1a   : > { %s69_s10 = ssub.s32 %s1051_s26, %s1602_s5  ;;  %s72_s11 = sadd.s32 1, %s1027_s20 }
  0x1b   : > { %s1606_s6 = smov (%p41_p5, %s1604_s6), 0  ;;  %p1208_p7 = por %p1194_p6, %p59_p4 }
  0x1c   : > { %1555 = sst [smem:[#allocation22_spill]] %s1606_s6  ;;  %p70_p8 = scmp.eq.s32.totalorder %s69_s10, 0 }
  0x1d   : > { %s1556_s12 = scalar_select %p1208_p7, 1, 0 }
  0x1e   : > { %s43_s13 = ssub.s32 %s1055_s27, %s1606_s6  ;;  %p79_p9 = scmp.ne.s32.totalorder %s1027_s20, %s1023_s19 }
  0x1f   : > { %p44_p10 = scmp.eq.s32.totalorder %s43_s13, 0  ;;  %p85_p11 = scmp.ne.s32.totalorder %s1023_s19, %s1019_s18 }
  0x20   : > { %s1219_s14 = scalar_select %p70_p8, %s1027_s20, %s72_s11  }
  0x21   : > { %s1222_s30 = scalar_select %p44_p10, %s1039_s23, %s46_s7  }
  0x22   : > { %1557 = sst [smem:[#allocation23_spill]] %s1219_s14  ;;  %p1226_p12 = por %p79_p9, %p54_p2 }
  0x23   : > { %1558 = sst [smem:[#allocation24_spill]] %s1222_s30  ;;  %p1232_p13 = por %p85_p11, %p1194_p6 }
  0x24   : > { %s123_s18 = sor.u32 %s69_s10, %s43_s13  ;;  %s126_s5 = sadd.s32 1, %s1015_s17 }
  0x25   : > { %s1560_s6 = scalar_select %p1232_p13, 1, 0 }
  0x26   : > { %p124_p0 = scmp.eq.s32.totalorder %s123_s18, 0  ;;  %p136_p5 = scmp.ne.s32.totalorder %s1015_s17, %s1011_s16 }
  0x27   : > { %s1561_s11 = sadd.s32 4294967295, %s1059_s28   ;;  %p142_p10 = scmp.ne.s32.totalorder %s1011_s16, %s1007_s15 }
  0x28   : > { %p137_p8 = scmp.eq.s32.totalorder %s1561_s11, 3  ;;  %s1564_s9 = sadd.s32 4294967294, %s1059_s28  }
  0x29   : > { %s1244_s7 = scalar_select %p124_p0, %s1015_s17, %s126_s5  }
  0x2a   : > { %p1246_p2 = por %p137_p8, %p136_p5  ;;  %p143_p6 = scmp.eq.s32.totalorder %s1564_s9, 3 }
  0x2b   : > { %1562 = sst [smem:[#allocation25_spill]] %s1244_s7  ;;  %p1255_p9 = por %p137_p8, %p53_p1 }
  0x2c   : > { %s1563_s30 = scalar_select %p1246_p2, 1, 0 }
  0x2d   : > { %s1565_s10 = scalar_select %p1255_p9, 1, 0 }
  0x2e   : > { %p1259_p11 = por %p143_p6, %p142_p10  ;;  %p1266_p0 = por %p143_p6, %p59_p4 }
  0x2f   : > { %p691_p5 = scmp.lt.s32.totalorder %s1059_s28, 4  ;;  %s189_s18 = sand.u32 1, %s1039_s23  }
  0x30   : > { %s1566_s13 = scalar_select %p1259_p11, 1, 0 }
  0x31   : > { %s1567_s5 = scalar_select %p1266_p0, 1, 0 }
  0x32   : > { %s626_s11 = sshll.u32 %s189_s18, 3  ;;  %s627_s14 = sshll.u32 %s1055_s27, 7 }
  0x33   : > { %1568 = sst [smem:[#allocation26_spill]] %s1567_s5  ;;  %s1569_s0 = sld [smem:[#allocation27_spill]] }
  0x34   : > { %s193_s15 = scalar_lea.vmem [#allocation5], %s626_s11  ;;  %p1282_p1 = pnand %p691_p5, %p1186_p3 }
  0x35   : > { %s200_s4 = sshll.u32 %s193_s15, 4  ;;  %p1288_p4 = pnand %p691_p5, %p1226_p12  ;;  %s1278_s4 = int_to_ptr.vmem [resolvable:$true] %s200_s4 }
  0x36   : > { %p819_p0 = pneg %p1282_p1 }
  0x39   : > { %s1276_s17 = scalar_lea.hbm %s1569_s0, %s627_s14  ;;  %s190_s14 = scalar_lea.sflag [#allocation6], %s189_s18 }
  0x3a   : > { %s817_s11 = scalar_lea.hbm %s1276_s17, 128  ;;  %s822_s29 = scalar_lea.hbm %s1569_s0, 256 }
  0x3b   : > { %p818_p6 = scmp.ne.s32.totalorder %s1276_s17, %s817_s11  ;;  %p823_p12 = scmp.lt.u32.totalorder %s1276_s17, %s1569_s0 }
  0x3c   : > { %p824_p5 = scmp.lt.u32.totalorder %s822_s29, %s817_s11  ;;  %p826_p10 = scmp.lt.u32.totalorder %s817_s11, %s1276_s17 }
  0x3d   : > { %p820_p3 = pnand %p819_p0, %p818_p6 }
  0x3e   : > { %p825_p8 = por %p824_p5, %p823_p12 }
  0x3f   : > { %p821_p11 = pneg %p820_p3 }
  0x40   : > { %p827_p9 = por %p826_p10, %p825_p8 }
  0x42   : > { %p828_p2 = pnand %p827_p9, %p821_p11 }
  0x44   : > { %831 = shalt.err (!%p828_p2)
}
  0x45   : > { %s832_s18 = scalar_lea.vmem %s1278_s4, 128  ;;  %s1061_s15 = smov [#allocation5]  }
  0x46   : > { %p833_p6 = scmp.ne.s32.totalorder %s1278_s4, %s832_s18  ;;  %s837_s8 = sshll.u32 %s1061_s15, 4  ;;  %s838_s8 = int_to_ptr.vmem [resolvable:$false] %s837_s8 }
  0x47   : > { %s839_s27 = scalar_lea.vmem %s838_s8, 256  ;;  %p840_p7 = scmp.lt.s32.totalorder %s1278_s4, %s838_s8 }
  0x48   : > { %p835_p3 = pnand %p833_p6, %p819_p0  ;;  %p841_p12 = scmp.lt.s32.totalorder %s839_s27, %s832_s18 }
  0x4a   : > { %p836_p13 = pneg %p835_p3  ;;  %p842_p5 = por %p841_p12, %p840_p7 }
  0x4c   : > { %p843_p8 = pnand %p842_p5, %p836_p13 }
  0x4e   : > { %846 = shalt.err (!%p843_p8)
}
  0x4f   : > { %680 = dma.hbm_to_vmem [thread:$0]  (!%p1282_p1), %s1276_s17, 128, %s1278_s4, %s190_s14  }
  0x50   : > { %p1572_p2 = scmp.lt.s32.totalorder %s1059_s28, 5  ;;  %p1573_p9 = scmp.ge.s32.totalorder %s1059_s28, 1 }
  0x51   : > { %s207_s29 = sand.u32 1, %s1027_s20   ;;  %s629_s9 = sshll.u32 %s1051_s26, 7 }
  0x52   : > { %p1323_p11 = pnand %p1573_p9, %p1572_p2  ;;  %s628_s18 = sshll.u32 %s207_s29, 5 }
  0x53   : > { %s1332_s8 = scalar_lea.hbm %s1529_s1, %s629_s9  ;;  %s211_s27 = scalar_lea.vmem [#allocation8], %s628_s18 }
  0x54   : > { %s217_s4 = sshll.u32 %s211_s27, 4  ;;  %s1336_s17 = scalar_lea.sflag [#allocation9], %s207_s29  ;;  %s1334_s4 = int_to_ptr.vmem [resolvable:$true] %s217_s4 }
  0x55   : > { %s847_s14 = scalar_lea.hbm %s1332_s8, 512  ;;  %p849_p13 = pneg %p1288_p4 }
  0x56   : > { %p848_p7 = scmp.ne.s32.totalorder %s1332_s8, %s847_s14  ;;  %s852_s5 = scalar_lea.hbm %s1529_s1, 1024 }
  0x57   : > { %p853_p10 = scmp.lt.u32.totalorder %s1332_s8, %s1529_s1  ;;  %p854_p6 = scmp.lt.u32.totalorder %s852_s5, %s847_s14 }
  0x58   : > { %p850_p0 = pnand %p849_p13, %p848_p7  ;;  %p856_p12 = scmp.lt.u32.totalorder %s847_s14, %s1332_s8 }
  0x59   : > { %p855_p3 = por %p854_p6, %p853_p10 }
  0x5a   : > { %p851_p1 = pneg %p850_p0 }
  0x5b   : > { %p857_p5 = por %p856_p12, %p855_p3 }
  0x5d   : > { %p858_p8 = pnand %p857_p5, %p851_p1 }
  0x5f   : > { %861 = shalt.err (!%p858_p8)
}
  0x60   : > { %s862_s29 = scalar_lea.vmem %s1334_s4, 512  ;;  %s1062_s18 = smov [#allocation8]  }
  0x61   : > { %p863_p2 = scmp.ne.s32.totalorder %s1334_s4, %s862_s29  ;;  %s867_s27 = sshll.u32 %s1062_s18, 4  ;;  %s868_s27 = int_to_ptr.vmem [resolvable:$false] %s867_s27 }
  0x62   : > { %s869_s0 = scalar_lea.vmem %s868_s27, 1024  ;;  %p870_p0 = scmp.lt.s32.totalorder %s1334_s4, %s868_s27 }
  0x63   : > { %p865_p9 = pnand %p863_p2, %p849_p13  ;;  %p871_p10 = scmp.lt.s32.totalorder %s869_s0, %s862_s29 }
  0x65   : > { %p866_p7 = pneg %p865_p9  ;;  %p872_p6 = por %p871_p10, %p870_p0 }
  0x67   : > { %p873_p3 = pnand %p872_p6, %p866_p7 }
  0x69   : > { %876 = shalt.err (!%p873_p3)
}
  0x6a   : > { %s1063_s26 = smov 256   ;;  %s1064_s14 = smov 128  }
  0x6b   : > { %s1065_s9 = smov 8   ;;  %235 = sbr.rel (%p1323_p11) target bundleno = 1125 (0x465), region = 32 }
  0x6c   : > { %683 = dma.hbm_to_vmem [thread:$0]  (!%p1288_p4), %s1332_s8, 512, %s1334_s4, %s1336_s17, %s1063_s26, %s1064_s14, %s1065_s9  }
  0x6d   : > { %s1367_s15 = sand.u32 (!%p1323_p11), 1, %s1035_s22   ;;  %p1575_p13 = scmp.ne.s32.totalorder (!%p1323_p11), %s1556_s12, 0 }
  0x6e   : > { %s631_s5 = sshll.u32 (!%p1323_p11), %s1367_s15, 3  ;;  %s238_s29 = scalar_lea.sflag (!%p1323_p11), [#allocation6], %s1367_s15 }
  0x6f   : > { %s1371_s18 = scalar_lea.vmem (!%p1323_p11), [#allocation5], %s631_s5 }
  0x72   : > { %990 = dma.done.wait (%p1575_p13), %s238_s29, 128  }
  0x73   : > { %992 = vsyncadd (%p1575_p13), %s238_s29, 4294967168  ;;  %s246_s7 = sand.u32 1, %s1023_s19   ;;  %p1576_p4 = scmp.ne.s32.totalorder %s1560_s6, 0 }
  0x74   : > { %s632_s11 = sshll.u32 %s246_s7, 5  ;;  %s247_s8 = scalar_lea.sflag [#allocation9], %s246_s7 }
  0x75   : > { %s1378_s4 = scalar_lea.vmem [#allocation8], %s632_s11 }
  0x76   : > { %994 = dma.done.wait (%p1576_p4), %s247_s8, 512  }
  0x77   : > { %996 = vsyncadd (%p1576_p4), %s247_s8, 4294966784  ;;  %s278_s17 = sand.u32 1, %s1011_s16   ;;  %p288_p11 = scmp.lt.s32.totalorder %s1043_s24, 1 }
  0x78   : > { %s1387_s12 = sshll.u32 %s278_s17, 3  ;;  %s1398_s6 = scalar_lea.vmem [#allocation11], %s631_s5 }
  0x79   : > { %s1391_s27 = scalar_select %p288_p11, %s1043_s24, 1 }
  0x7a   : > { %s280_s9 = scalar_lea.vmem [#allocation10], %s1387_s12  ;;  %p635_p1 = scmp.ne.s32.totalorder %s1043_s24, 0 }
  0x7b   : > { %s290_s14 = scalar_lea.vmem %s1530_s2, %s1391_s27  ;;  %v295_v0 = vld [vmem:[%s1371_s18] sm:$0xff] (!%p635_p1)  ;;  %vm297_vm0 = vcmask (!%p635_p1), 261120   ;;  %vm301_vm1 = vcmask (!%p635_p1), 7168   ;;  %v1066_v3 = vmov (!%p635_p1), inf   ;;  %v1067_v4 = vmov (!%p635_p1), 0  }
  0x7c   : > { %294 = sbr.rel (%p635_p1) target bundleno = 270 (0x10e), region = 44  ;;  %v296_v1 = vmul.f32 (!%p635_p1), %v295_v0, %v295_v0  ;;  %303 = vst.msk [vmem:[#allocation2] sm:$0xff] (!%p635_p1), %vm301_vm1, %v1066_v3  ;;  %304 = vst.msk [vmem:[#allocation3] sm:$0xff] (!%p635_p1), %vm301_vm1, %v1067_v4 }
  0x7e   : > { %v298_v2 = vsel (!%p635_p1), %vm297_vm0, %v296_v1, 0.0 }
  0x7f   : > { %299 = vadd.xlane.f32.xlu0 (!%p635_p1), %v298_v2 }
 0x10c   : > { %v300_v5 = vpop.xlane.xlu0 %299 }
 0x10d   : > { %302 = vst.msk [vmem:[#allocation4] sm:$0xff] %vm301_vm1, %v300_v5 }
 0x10e PF: > { %v306_v6 = vld [vmem:[%s1378_s4] sm:$0xff]  ;;  %v307_v7 = vld [vmem:[%s1378_s4 + $0x8] sm:$0xff]  ;;  %v308_v8 = vld [vmem:[%s1378_s4 + $0x10] sm:$0xff]  ;;  %v1068_v9 = vmov 0.0|0.0   ;;  %vm1069_vm2 = vmmov 0   ;;  %v1070_v12 = vmov 0.0   ;;  %v403_v24 = vlaneseq }
 0x10f   : > { %663 = vmatprep.subr.bf16.mxu0 %v1068_v9  ;;  %v664_v10 = vpack.c.bf16 %v307_v7, %v306_v6  ;;  %v309_v11 = vld [vmem:[%s1378_s4 + $0x18] sm:$0xff]  ;;  %660 = vmatprep.mubr.msk.f32.mxu0 %vm1069_vm2, %v1070_v12  ;;  %v1071_v14 = vmov 0   ;;  %vm310_vm3 = vcmask 261120   ;;  %s638_s7 = sshll.u32 %s1043_s24, 7  ;;  %vm427_vm4 = vcmask 7168   ;;  %v429_v42 = vld [vmem:[#allocation3] sm:$0xff] }
 0x110   : > { %815 = vset.pattern.permute.xlu0 %v1071_v14  ;;  %v667_v15 = vpack.c.bf16 %v309_v11, %v308_v8  ;;  %v305_v16 = vld [vmem:[%s1371_s18] sm:$0xff]  ;;  %v404_v25 = vand.u32 127, %v403_v24  ;;  %v406_v26 = vstv %s638_s7  ;;  %p639_p12 = scmp.ne.s32.totalorder %s1043_s24, 1 }
 0x111   : > { %665 = vmatpush3.bf16.msra.mxu0 %v664_v10  ;;  %v637_v19 = vld [vmem:[%s290_s14] ss:$0 sm:$0xff]  ;;  %v1072_v46 = vmov (!%p639_p12), 0  }
 0x112   : > { %666 = vmatprep.subr.bf16.mxu0 %v1068_v9  ;;  %v407_v27 = vadd.s32 %v406_v26, %v404_v25  ;;  %v424_v28 = vld [vmem:[#allocation2] sm:$0xff] }
 0x114   : > { %v384_v13 = vld [vmem:[#allocation4] sm:$0xff] }
 0x115   : > { %387 = vperm.xlu0 %815, %v384_v13   ;;  %668 = vmatpush3.bf16.msra.mxu0 %v667_v15 }
 0x118   : > { %661 = vmatmul.mubr.msk.f32.vlgmr.msra.gmra.mrb[0].mxu0 %vm310_vm3, %v305_v16 }
 0x119   : > { %816 = vset.pattern.permute.xlu0 (!%p639_p12), %v1072_v46 }
 0x194   : > { %v388_v17 = vpop.permute.xlu0 %387 }
 0x1eb   : > { %v380_v18 = vpop.f32.mrb[0].mxu0 }
 0x1ec   : > { %v390_v20 = vadd.f32 %v388_v17, %v380_v18  ;;  %v662_v21 = vpop.f32.mrb[1].mxu0 }
 0x1ee   : > { %v398_v22 = vadd.f32 %v637_v19, %v390_v20 }
 0x1f0   : > { %v399_v23 = vmax.f32 %v398_v22, 0.0 }
 0x1f2   : > { %400 = vst [vmem:[%s280_s9] sm:$0xff] %v399_v23  ;;  %401 = vmin.xlane.f32.xlu0 %v399_v23 }
 0x27f   : > { %v402_v29 = vpop.xlane.xlu0 %401 }
 0x280   : > { %vm408_vm5 = vcmp.eq.f32.partialorder %v399_v23, %v402_v29  ;;  %vm425_vm6 = vcmp.lt.f32.partialorder %v402_v29, %v424_v28 }
 0x281   : > { %v409_v30 = vsel %vm408_vm5, %v407_v27, 2147483647  ;;  %v426_v31 = vsel %vm425_vm6, %v402_v29, %v424_v28 }
 0x282   : > { %428 = vst.msk [vmem:[#allocation2] sm:$0xff] %vm427_vm4, %v426_v31  ;;  %v411_v32 = vshra.s32 %v409_v30, 16  ;;  %v410_v34 = vand.u32 65535, %v409_v30 }
 0x284   : > { %v413_v33 = vcvt.s32.f32 %v411_v32  ;;  %v412_v36 = vcvt.s32.f32 %v410_v34 }
 0x286   : > { %414 = vmin.xlane.f32.xlu1 %v413_v33 }
 0x313   : > { %v415_v35 = vpop.xlane.xlu1 %414 }
 0x314   : > { %vm416_vm7 = vcmp.eq.f32.partialorder %v413_v33, %v415_v35  ;;  %v421_v38 = vcvt.f32.s32 %v415_v35 }
 0x315   : > { %v417_v37 = vsel %vm416_vm7, %v412_v36, inf }
 0x316   : > { %418 = vmin.xlane.f32.xlu1 %v417_v37  ;;  %v422_v40 = vshll.u32 %v421_v38, 16 }
 0x3a3   : > { %v419_v39 = vpop.xlane.xlu1 %418  ;;  %435 = sbr.rel (%p639_p12) target bundleno = 1074 (0x432), region = 48 }
 0x3a4   : > { %v420_v41 = vcvt.f32.s32 %v419_v39 }
 0x3a6   : > { %v423_v43 = vadd.s32 %v422_v40, %v420_v41 }
 0x3a8   : > { %v430_v44 = vsel %vm425_vm6, %v423_v43, %v429_v42 }
 0x3a9   : > { %431 = vst.msk [vmem:[#allocation3] sm:$0xff] %vm427_vm4, %v430_v44 }
 0x3b0   : > { %v436_v45 = vld [vmem:[#allocation3] sm:$0xff] }
 0x3b1   : > { %438 = vperm.xlu0 %816, %v436_v45  }
 0x430   : > { %v439_v47 = vpop.permute.xlu0 %438 }
 0x431   : > { %440 = vst [vmem:[%s1398_s6] sm:$0xff] %v439_v47 }
 0x432 PF: > { %s642_s18 = sshll.u32 %s1047_s25, 1  ;;  %s462_s8 = sshll.u32 %s280_s9, 4  ;;  %s1425_s8 = int_to_ptr.vmem [resolvable:$true] %s462_s8 }
 0x433   : > { %s458_s11 = sadd.s32 %s1043_s24, %s642_s18  ;;  %s442_s14 = scalar_lea.sflag [#allocation7], %s278_s17 }
 0x434   : > { %s643_s4 = sshll.u32 %s458_s11, 7  ;;  %s877_s5 = scalar_lea.vmem %s1425_s8, 128 }
 0x435   : > { %s460_s26 = scalar_lea.hbm %s1531_s3, %s643_s4  ;;  %p878_p5 = scmp.ne.s32.totalorder %s1425_s8, %s877_s5 }
 0x436   : > { %p1577_p8 = scmp.ne.s32.totalorder %s1563_s30, 0  ;;  %s1073_s24 = smov [#allocation10]  }
 0x437   : > { %s881_s12 = sshll.u32 %s1073_s24, 4  ;;  %s882_s12 = int_to_ptr.vmem [resolvable:$false] %s881_s12 }
 0x438   : > { %p879_p2 = pnand %p878_p5, %p1577_p8  ;;  %s883_s9 = scalar_lea.vmem %s882_s12, 256 }
 0x439   : > { %p884_p7 = scmp.lt.s32.totalorder %s1425_s8, %s882_s12  ;;  %p885_p0 = scmp.lt.s32.totalorder %s883_s9, %s877_s5 }
 0x43a   : > { %p880_p9 = pneg %p879_p2 }
 0x43b   : > { %p886_p10 = por %p885_p0, %p884_p7 }
 0x43d   : > { %p887_p6 = pnand %p886_p10, %p880_p9 }
 0x43f   : > { %890 = shalt.err (!%p887_p6)
}
 0x440   : > { %s891_s29 = scalar_lea.hbm %s460_s26, 128  ;;  %s895_s18 = scalar_lea.hbm %s1531_s3, 512 }
 0x441   : > { %p892_p3 = scmp.ne.s32.totalorder %s460_s26, %s891_s29  ;;  %p896_p11 = scmp.lt.u32.totalorder %s460_s26, %s1531_s3 }
 0x442   : > { %p897_p1 = scmp.lt.u32.totalorder %s895_s18, %s891_s29  ;;  %p899_p5 = scmp.lt.u32.totalorder %s891_s29, %s460_s26 }
 0x443   : > { %p893_p13 = pnand %p892_p3, %p1577_p8 }
 0x444   : > { %p898_p12 = por %p897_p1, %p896_p11 }
 0x445   : > { %p894_p4 = pneg %p893_p13 }
 0x446   : > { %p900_p2 = por %p899_p5, %p898_p12 }
 0x448   : > { %p901_p9 = pnand %p900_p2, %p894_p4 }
 0x44a   : > { %904 = shalt.err (!%p901_p9)
}
 0x44b   : > { %673 = dma.vmem_to_hbm [thread:$0]  (%p1577_p8), %s1425_s8, 128, %s460_s26, %s442_s14  }
 0x44c   : > { %s644_s27 = sshll.u32 %s1047_s25, 7  ;;  %s475_s0 = sshll.u32 %s1398_s6, 4  ;;  %s476_s0 = int_to_ptr.vmem [resolvable:$true] %s475_s0 }
 0x44d   : > { %s1578_s12 = sld [smem:[#allocation28_spill]]  ;;  %s447_s29 = scalar_lea.sflag [#allocation12], %s1367_s15 }
 0x44e   : > { %s905_s17 = scalar_lea.vmem %s476_s0, 128  ;;  %p1579_p0 = scmp.ne.s32.totalorder %s1565_s10, 0 }
 0x44f   : > { %p906_p7 = scmp.ne.s32.totalorder %s476_s0, %s905_s17  ;;  %s1074_s30 = smov [#allocation11]  }
 0x450   : > { %s909_s7 = sshll.u32 %s1074_s30, 4  ;;  %s910_s7 = int_to_ptr.vmem [resolvable:$false] %s909_s7 }
 0x451   : > { %p907_p10 = pnand %p906_p7, %p1579_p0  ;;  %s911_s18 = scalar_lea.vmem %s910_s7, 256 }
 0x452   : > { %p912_p3 = scmp.lt.s32.totalorder %s476_s0, %s910_s7  ;;  %p913_p8 = scmp.lt.s32.totalorder %s911_s18, %s905_s17 }
 0x453   : > { %s1453_s9 = scalar_lea.hbm %s1578_s12, %s644_s27  ;;  %p908_p6 = pneg %p907_p10 }
 0x454   : > { %p914_p13 = por %p913_p8, %p912_p3 }
 0x456   : > { %p915_p4 = pnand %p914_p13, %p908_p6 }
 0x458   : > { %918 = shalt.err (!%p915_p4)
}
 0x459   : > { %s919_s25 = scalar_lea.hbm %s1453_s9, 128  ;;  %s923_s8 = scalar_lea.hbm %s1578_s12, 256 }
 0x45a   : > { %p920_p11 = scmp.ne.s32.totalorder %s1453_s9, %s919_s25  ;;  %p924_p5 = scmp.lt.u32.totalorder %s1453_s9, %s1578_s12 }
 0x45b   : > { %p925_p2 = scmp.lt.u32.totalorder %s923_s8, %s919_s25  ;;  %p927_p7 = scmp.lt.u32.totalorder %s919_s25, %s1453_s9 }
 0x45c   : > { %p921_p1 = pnand %p920_p11, %p1579_p0 }
 0x45d   : > { %p926_p9 = por %p925_p2, %p924_p5 }
 0x45e   : > { %p922_p12 = pneg %p921_p1 }
 0x45f   : > { %p928_p10 = por %p927_p7, %p926_p9 }
 0x461   : > { %p929_p6 = pnand %p928_p10, %p922_p12 }
 0x463   : > { %932 = shalt.err (!%p929_p6)
}
 0x464   : > { %674 = dma.vmem_to_hbm [thread:$0]  (%p1579_p0), %s476_s0, 128, %s1453_s9, %s447_s29  }
 0x465 PF: > { %s1580_s11 = sld [smem:[#allocation17_spill]]  ;;  %p692_p3 = scmp.ge.s32.totalorder %s1059_s28, 2 }
 0x466   : > { %p1581_p8 = scmp.ne.s32.totalorder %s1566_s13, 0 }
 0x468   : > { %p685_p13 = pnand %p692_p3, %p1581_p8 }
 0x46b   : > { %s487_s4 = sand.u32 1, %s1580_s11  }
 0x46c   : > { %s488_s27 = scalar_lea.sflag [#allocation7], %s487_s4 }
 0x46d   : > { %998 = dma.done.wait (!%p685_p13), %s488_s27, 128  }
 0x46e   : > { %1000 = vsyncadd (!%p685_p13), %s488_s27, 4294967168  ;;  %s1582_s5 = sld [smem:[#allocation26_spill]]  ;;  %s496_s24 = sand.u32 1, %s1031_s21  }
 0x46f   : > { %s497_s17 = scalar_lea.sflag [#allocation12], %s496_s24 }
 0x474   : > { %p1583_p4 = scmp.ne.s32.totalorder %s1582_s5, 0 }
 0x476   : > { %p688_p11 = pnand %p692_p3, %p1583_p4 }
 0x478   : > { %1002 = dma.done.wait (!%p688_p11), %s497_s17, 128  }
 0x479   : > { %1004 = vsyncadd (!%p688_p11), %s497_s17, 4294967168  ;;  %s27_s28 = sadd.s32 1, %s1059_s28   ;;  %s1585_s13 = sld [smem:[#allocation18_spill]] }
 0x47a   : > { %p1481_p0 = scmp.ge.s32.totalorder %s27_s28, 6   ;;  %s1586_s17 = sld [smem:[#allocation25_spill]] }
 0x47b   : > { %s1587_s0 = sld [smem:[#allocation23_spill]]  ;;  %s1588_s9 = sld [smem:[#allocation24_spill]] }
 0x47c   : > { %s1589_s24 = sld [smem:[#allocation19_spill]]  ;;  %s1590_s25 = sld [smem:[#allocation20_spill]] }
 0x47d   : > { %s1591_s26 = sld [smem:[#allocation21_spill]]  ;;  %s1592_s27 = sld [smem:[#allocation22_spill]] }
 0x47e   : > { %s1593_s15 = smov %s1011_s16  ;;  %s1595_s18 = smov %s1023_s19 }
 0x47f   : > { %s1594_s16 = smov %s1585_s13  ;;  %s1596_s19 = smov %s1027_s20 }
 0x480   : > { %s1598_s21 = smov %s1035_s22  ;;  %s1599_s22 = smov %s1039_s23 }
 0x481   : > { %s1597_s20 = smov %s1587_s0  ;;  %s1600_s23 = smov %s1588_s9 }
 0x482   :  { %26 = sbr.rel (!%p1481_p0) target bundleno = 17 (0x11), region = 118 }
 0x489   :  { %502 = vsyncpa [#allocation6], 1 }
 0x48a   :  { %504 = vsyncpa [#allocation6 + $0x1], 1 }
 0x48b   :  { %505 = vsyncpa [#allocation9], 1 }
 0x48c   :  { %507 = vsyncpa [#allocation9 + $0x1], 1 }
 0x48d   :  { %508 = vsyncpa [#allocation7], 1 }
 0x48e   :  { %510 = vsyncpa [#allocation7 + $0x1], 1 }
 0x48f   :  { %511 = vsyncpa [#allocation12], 1 }
 0x490   :  { %513 = vsyncpa [#allocation12 + $0x1], 1 }

</bundles_post_ra>
